<compile_context>
chip_gen: v7x
topology: tpu7x:2x2x1
jax: 0.10.0
libtpu: 0.0.40
codegen_flags: <defaults>
</compile_context>

<pallas_src>
import jax
import jax.numpy as jnp
import numpy as np
from jax import lax
from jax.experimental import pallas as pl
from jax.experimental.pallas import tpu as pltpu


def _gelu_tanh(v):
    # TODO(synk): PyTorch nn.GELU() defaults to the exact erf form; the tanh
    # approximation is used since erf lowering is not guaranteed in Mosaic.
    c = 0.7978845608028654  # sqrt(2/pi)
    return 0.5 * v * (1.0 + jnp.tanh(c * (v + 0.044715 * v * v * v)))


# ----------------------------- Pallas kernel --------------------------------
def double_conv_kernel(xpad_ref, b1_ref, s1_ref, t1_ref,
                       b2_ref, s2_ref, t2_ref, o_ref):
    # xpad_ref : (1, H+2, W*Cin)    bf16  concat(x2, x1up), H-padded, lane-dense
    # b1_ref   : (3, W*Cin, W*Cmid) bf16  banded conv1 weights (one band per dy)
    # s1,t1    : (1, W*Cmid)        f32   folded bias+BN scale/shift, W-tiled
    # b2_ref   : (3, W*Cmid, W*Cout) bf16
    # s2,t2    : (1, W*Cout)        f32
    # o_ref    : (1, H, W*Cout)     f32   lane-dense output
    H = o_ref.shape[1]
    cdt = xpad_ref.dtype                     # bf16 MXU operand dtype

    x = xpad_ref[0]                          # (H+2, W*Cin)

    # --- conv1 + BN1 + GELU: one matmul per kernel row, f32 accumulation.
    #     W-direction SAME padding is encoded as zeros in the band matrices. ---
    acc1 = jnp.dot(x[0:H, :], b1_ref[0], preferred_element_type=jnp.float32)
    for dy in (1, 2):
        acc1 = acc1 + jnp.dot(x[dy:dy + H, :], b1_ref[dy],
                              preferred_element_type=jnp.float32)
    h1 = _gelu_tanh(acc1 * s1_ref[...] + t1_ref[...]).astype(cdt)   # (H, W*Cmid)

    # --- SAME padding along H for conv2: two zero rows, value-level
    #     (no scratch buffer, no per-step halo zeroing). ---
    zrow = jnp.zeros((1, h1.shape[1]), cdt)
    h1p = jnp.concatenate([zrow, h1, zrow], axis=0)                 # (H+2, W*Cmid)

    # --- conv2 + BN2 + GELU ---
    acc2 = jnp.dot(h1p[0:H, :], b2_ref[0], preferred_element_type=jnp.float32)
    for dy in (1, 2):
        acc2 = acc2 + jnp.dot(h1p[dy:dy + H, :], b2_ref[dy],
                              preferred_element_type=jnp.float32)
    # single lane-dense (H, W*Cout) store per grid step
    o_ref[0] = _gelu_tanh(acc2 * s2_ref[...] + t2_ref[...]).astype(o_ref.dtype)


def double_conv_pallas(xpad, b1, s1w, t1w, b2, s2w, t2w):
    # xpad: (N, H+2, W*Cin) bf16;  b*: (3, W*Ci, W*Co) bf16;  s/t: (1, W*Co) f32
    N, Hp2, WCin = xpad.shape
    H = Hp2 - 2
    WCmid = b1.shape[2]
    WCout = b2.shape[2]

    return pl.pallas_call(
        double_conv_kernel,
        out_shape=jax.ShapeDtypeStruct((N, H, WCout), jnp.float32),
        grid_spec=pltpu.PrefetchScalarGridSpec(
            num_scalar_prefetch=0,
            grid=(N,),                       # one image / step: both v7x TCs busy
            in_specs=[
                pl.BlockSpec((1, Hp2, WCin), lambda n: (n, 0, 0)),
                pl.BlockSpec((3, WCin, WCmid), lambda n: (0, 0, 0)),
                pl.BlockSpec((1, WCmid), lambda n: (0, 0)),
                pl.BlockSpec((1, WCmid), lambda n: (0, 0)),
                pl.BlockSpec((3, WCmid, WCout), lambda n: (0, 0, 0)),
                pl.BlockSpec((1, WCout), lambda n: (0, 0)),
                pl.BlockSpec((1, WCout), lambda n: (0, 0)),
            ],
            out_specs=pl.BlockSpec((1, H, WCout), lambda n: (n, 0, 0)),
        ),
        compiler_params=pltpu.CompilerParams(
            dimension_semantics=("parallel",),
        ),
    )(xpad, b1, s1w, t1w, b2, s2w, t2w)


# --------------------- host-side weight preparation --------------------------
def _make_band_weights(w_hwio, W):
    """(3,3,Cin,Cout) HWIO -> (3, W*Cin, W*Cout) banded-Toeplitz matrices.

    band[dy][wi*Cin+ci, wo*Cout+co] = w[dy, wi-wo+1, ci, co] when |wi-wo| <= 1,
    zero otherwise, so SAME padding along W is implicit (zero band entries).
    """
    w = np.asarray(w_hwio, np.float32)
    KH, KW, Cin, Cout = w.shape
    band = np.zeros((KH, W * Cin, W * Cout), np.float32)
    for wo in range(W):
        for dx in range(KW):
            wi = wo + dx - KW // 2
            if 0 <= wi < W:
                band[:, wi * Cin:(wi + 1) * Cin,
                     wo * Cout:(wo + 1) * Cout] = w[:, dx]
    return band


def fold_params_for_kernel(raw_params, W):
    """Pre-reshape weights host-side: band matrices + W-tiled scale/shift."""
    w1, s1, t1, w2, s2, t2 = raw_params
    b1 = jnp.asarray(_make_band_weights(w1, W), jnp.bfloat16)
    b2 = jnp.asarray(_make_band_weights(w2, W), jnp.bfloat16)
    s1w = jnp.tile(jnp.asarray(s1, jnp.float32), W).reshape(1, -1)
    t1w = jnp.tile(jnp.asarray(t1, jnp.float32), W).reshape(1, -1)
    s2w = jnp.tile(jnp.asarray(s2, jnp.float32), W).reshape(1, -1)
    t2w = jnp.tile(jnp.asarray(t2, jnp.float32), W).reshape(1, -1)
    return b1, s1w, t1w, b2, s2w, t2w


# ------------------------------ JAX glue -------------------------------------
def bilinear_upsample_x2_align_corners_nhwc(x):
    # x: (N, H, W, C) -> (N, 2H, 2W, C); matches nn.Upsample(scale_factor=2,
    # mode='bilinear', align_corners=True).
    # TODO(synk): data-dependent gather kept in plain JAX (cheap on the
    # low-resolution tensor; no clean static-BlockSpec Pallas equivalent).
    N, H, W, C = x.shape
    Ho, Wo = 2 * H, 2 * W

    def axis_coords(out_size, in_size):
        if in_size == 1:
            lo = jnp.zeros((out_size,), jnp.int32)
            return lo, lo, jnp.zeros((out_size,), jnp.float32)
        src = jnp.arange(out_size, dtype=jnp.float32) * (in_size - 1) / (out_size - 1)
        lo = jnp.floor(src).astype(jnp.int32)
        hi = jnp.minimum(lo + 1, in_size - 1)
        return lo, hi, src - lo.astype(jnp.float32)

    y0, y1, fy = axis_coords(Ho, H)
    x0, x1i, fx = axis_coords(Wo, W)
    top = x[:, y0, :, :]
    bot = x[:, y1, :, :]
    rows = top * (1.0 - fy)[None, :, None, None] + bot * fy[None, :, None, None]
    left = rows[:, :, x0, :]
    right = rows[:, :, x1i, :]
    return left * (1.0 - fx)[None, None, :, None] + right * fx[None, None, :, None]


def unet_up_forward(x1, x2, kernel_params):
    """UNetUp.forward: upsample x1, pad to x2's size, concat [x2, x1], DoubleConv."""
    b1, s1w, t1w, b2, s2w, t2w = kernel_params
    x1_nhwc = jnp.transpose(x1, (0, 2, 3, 1))
    x2_nhwc = jnp.transpose(x2, (0, 2, 3, 1))
    x1u = bilinear_upsample_x2_align_corners_nhwc(x1_nhwc)
    diffY = x2_nhwc.shape[1] - x1u.shape[1]
    diffX = x2_nhwc.shape[2] - x1u.shape[2]
    x1p = jnp.pad(x1u, ((0, 0),
                        (diffY // 2, diffY - diffY // 2),
                        (diffX // 2, diffX - diffX // 2),
                        (0, 0)))
    xcat = jnp.concatenate([x2_nhwc, x1p], axis=-1)              # (N, H, W, Cin)
    N, H, W, Cin = xcat.shape
    # Lane-dense (H, W*C) fold + H-direction SAME padding: tiny fused XLA ops.
    xfold = jnp.pad(xcat.reshape(N, H, W * Cin),
                    ((0, 0), (1, 1), (0, 0))).astype(jnp.bfloat16)
    out_fold = double_conv_pallas(xfold, b1, s1w, t1w, b2, s2w, t2w)
    Cout = b2.shape[2] // W
    return jnp.transpose(out_fold.reshape(N, H, W, Cout), (0, 3, 1, 2))  # NCHW


def init_unet_up_params(key, in_channels, out_channels):
    # DoubleConv(in_channels, out_channels, mid_channels=in_channels // 2, 'gelu')
    mid_channels = in_channels // 2
    eps = 1e-5
    ks = jax.random.split(key, 12)

    def conv_bn(kw, kb, kg, kbe, km, kv, cin, cout):
        w = 0.1 * jax.random.normal(kw, (3, 3, cin, cout), jnp.float32)      # HWIO
        b = 0.05 * jax.random.normal(kb, (cout,), jnp.float32)
        gamma = 1.0 + 0.1 * jax.random.normal(kg, (cout,), jnp.float32)
        beta = 0.05 * jax.random.normal(kbe, (cout,), jnp.float32)
        mean = 0.05 * jax.random.normal(km, (cout,), jnp.float32)
        var = 0.9 + 0.2 * jax.random.uniform(kv, (cout,), jnp.float32)
        # BN(conv(x) + b) = conv(x) * scale + shift   (eval-mode BatchNorm)
        scale = gamma / jnp.sqrt(var + eps)
        shift = (b - mean) * scale + beta
        return w, scale, shift

    w1, s1, t1 = conv_bn(*ks[0:6], in_channels, mid_channels)
    w2, s2, t2 = conv_bn(*ks[6:12], mid_channels, out_channels)
    return w1, s1, t1, w2, s2, t2


# ------------------------- pure-JAX reference --------------------------------
def ref_unet_up(x1, x2, raw_params):
    # Mirrors the kernel's precision policy (bf16 conv operands, f32 accum,
    # f32 element-wise, tanh-GELU) so the numerical check stays tight.
    w1, s1, t1, w2, s2, t2 = raw_params
    x1_nhwc = jnp.transpose(x1, (0, 2, 3, 1))
    x2_nhwc = jnp.transpose(x2, (0, 2, 3, 1))
    x1u = bilinear_upsample_x2_align_corners_nhwc(x1_nhwc)
    diffY = x2_nhwc.shape[1] - x1u.shape[1]
    diffX = x2_nhwc.shape[2] - x1u.shape[2]
    x1p = jnp.pad(x1u, ((0, 0),
                        (diffY // 2, diffY - diffY // 2),
                        (diffX // 2, diffX - diffX // 2),
                        (0, 0)))
    x = jnp.concatenate([x2_nhwc, x1p], axis=-1).astype(jnp.bfloat16)
    dn = ('NHWC', 'HWIO', 'NHWC')
    y = lax.conv_general_dilated(x, w1.astype(jnp.bfloat16), (1, 1), 'SAME',
                                 dimension_numbers=dn,
                                 preferred_element_type=jnp.float32)
    y = _gelu_tanh(y * s1.reshape(1, 1, 1, -1) + t1.reshape(1, 1, 1, -1))
    y = lax.conv_general_dilated(y.astype(jnp.bfloat16), w2.astype(jnp.bfloat16),
                                 (1, 1), 'SAME', dimension_numbers=dn,
                                 preferred_element_type=jnp.float32)
    y = _gelu_tanh(y * s2.reshape(1, 1, 1, -1) + t2.reshape(1, 1, 1, -1))
    return jnp.transpose(y, (0, 3, 1, 2))


if __name__ == "__main__":
    key = jax.random.PRNGKey(0)
    k1, k2, kp = jax.random.split(key, 3)

    N = 2
    in_channels, out_channels = 8, 8
    # Standard UNet bilinear path: x1 (low-res) and x2 (skip) each carry
    # in_channels // 2 channels; concat -> in_channels for DoubleConv.
    x1 = jax.random.normal(k1, (N, in_channels // 2, 8, 8), jnp.float32)
    x2 = jax.random.normal(k2, (N, in_channels // 2, 16, 16), jnp.float32)

    raw_params = init_unet_up_params(kp, in_channels, out_channels)
    kernel_params = fold_params_for_kernel(raw_params, W=x2.shape[3])

    fwd = jax.jit(unet_up_forward)
    out = jax.block_until_ready(fwd(x1, x2, kernel_params))
    assert out.shape == (N, out_channels, 16, 16), out.shape

    ref = jax.block_until_ready(ref_unet_up(x1, x2, raw_params))
    np.testing.assert_allclose(np.asarray(out), np.asarray(ref),
                               rtol=2e-3, atol=2e-3)
    print("KERNEL_OK")
</pallas_src>

<mosaic_0001>
module attributes {stable_mosaic.version = 11 : i64} {
  func.func @double_conv_kernel(%arg0: i32, %arg1: memref<1x18x128xbf16, #tpu.memory_space<vmem>>, %arg2: memref<3x128x64xbf16, #tpu.memory_space<vmem>>, %arg3: memref<1x64xf32, #tpu.memory_space<vmem>>, %arg4: memref<1x64xf32, #tpu.memory_space<vmem>>, %arg5: memref<3x64x128xbf16, #tpu.memory_space<vmem>>, %arg6: memref<1x128xf32, #tpu.memory_space<vmem>>, %arg7: memref<1x128xf32, #tpu.memory_space<vmem>>, %arg8: memref<1x16x128xf32, #tpu.memory_space<vmem>>) attributes {dimension_semantics = [#tpu.dimension_semantics<parallel>], iteration_bounds = array<i64: 2>, scalar_prefetch = 0 : i64, scratch_operands = 0 : i64, tpu.core_type = #tpu.core_type<tc>, window_params = [{transform_indices = @transform_0, window_bounds = array<i64: 1, 18, 128>}, {pipeline_mode = #tpu.pipeline_mode<synchronous>, transform_indices = @transform_1, window_bounds = array<i64: 3, 128, 64>}, {pipeline_mode = #tpu.pipeline_mode<synchronous>, transform_indices = @transform_2, window_bounds = array<i64: 1, 64>}, {pipeline_mode = #tpu.pipeline_mode<synchronous>, transform_indices = @transform_3, window_bounds = array<i64: 1, 64>}, {pipeline_mode = #tpu.pipeline_mode<synchronous>, transform_indices = @transform_4, window_bounds = array<i64: 3, 64, 128>}, {pipeline_mode = #tpu.pipeline_mode<synchronous>, transform_indices = @transform_5, window_bounds = array<i64: 1, 128>}, {pipeline_mode = #tpu.pipeline_mode<synchronous>, transform_indices = @transform_6, window_bounds = array<i64: 1, 128>}, {transform_indices = @transform_7, window_bounds = array<i64: 1, 16, 128>}]} {
    %c0 = arith.constant 0 : index
    %c0_0 = arith.constant 0 : index
    %c0_1 = arith.constant 0 : index
    %0 = vector.load %arg1[%c0, %c0_0, %c0_1] : memref<1x18x128xbf16, #tpu.memory_space<vmem>>, vector<1x18x128xbf16>
    %1 = vector.shape_cast %0 : vector<1x18x128xbf16> to vector<18x128xbf16>
    %2 = vector.extract_strided_slice %1 {offsets = [0, 0], sizes = [16, 128], strides = [1, 1]} : vector<18x128xbf16> to vector<16x128xbf16>
    %c0_2 = arith.constant 0 : index
    %c0_3 = arith.constant 0 : index
    %c0_4 = arith.constant 0 : index
    %3 = vector.load %arg2[%c0_2, %c0_3, %c0_4] : memref<3x128x64xbf16, #tpu.memory_space<vmem>>, vector<1x128x64xbf16>
    %4 = vector.shape_cast %3 : vector<1x128x64xbf16> to vector<128x64xbf16>
    %cst = arith.constant dense<0.000000e+00> : vector<16x64xf32>
    %5 = tpu.matmul %2, %4, %cst {dimension_numbers = #tpu.dot_dimension_numbers<[1], [0], [0], [1], [0, 0, 1, 1], [], []>} : vector<16x128xbf16>, vector<128x64xbf16>, vector<16x64xf32> -> vector<16x64xf32>
    %6 = vector.extract_strided_slice %1 {offsets = [1, 0], sizes = [16, 128], strides = [1, 1]} : vector<18x128xbf16> to vector<16x128xbf16>
    %c1 = arith.constant 1 : index
    %c0_5 = arith.constant 0 : index
    %c0_6 = arith.constant 0 : index
    %7 = vector.load %arg2[%c1, %c0_5, %c0_6] : memref<3x128x64xbf16, #tpu.memory_space<vmem>>, vector<1x128x64xbf16>
    %8 = vector.shape_cast %7 : vector<1x128x64xbf16> to vector<128x64xbf16>
    %cst_7 = arith.constant dense<0.000000e+00> : vector<16x64xf32>
    %9 = tpu.matmul %6, %8, %cst_7 {dimension_numbers = #tpu.dot_dimension_numbers<[1], [0], [0], [1], [0, 0, 1, 1], [], []>} : vector<16x128xbf16>, vector<128x64xbf16>, vector<16x64xf32> -> vector<16x64xf32>
    %10 = arith.addf %5, %9 : vector<16x64xf32>
    %11 = vector.extract_strided_slice %1 {offsets = [2, 0], sizes = [16, 128], strides = [1, 1]} : vector<18x128xbf16> to vector<16x128xbf16>
    %c2 = arith.constant 2 : index
    %c0_8 = arith.constant 0 : index
    %c0_9 = arith.constant 0 : index
    %12 = vector.load %arg2[%c2, %c0_8, %c0_9] : memref<3x128x64xbf16, #tpu.memory_space<vmem>>, vector<1x128x64xbf16>
    %13 = vector.shape_cast %12 : vector<1x128x64xbf16> to vector<128x64xbf16>
    %cst_10 = arith.constant dense<0.000000e+00> : vector<16x64xf32>
    %14 = tpu.matmul %11, %13, %cst_10 {dimension_numbers = #tpu.dot_dimension_numbers<[1], [0], [0], [1], [0, 0, 1, 1], [], []>} : vector<16x128xbf16>, vector<128x64xbf16>, vector<16x64xf32> -> vector<16x64xf32>
    %15 = arith.addf %10, %14 : vector<16x64xf32>
    %c0_11 = arith.constant 0 : index
    %c0_12 = arith.constant 0 : index
    %16 = vector.load %arg3[%c0_11, %c0_12] : memref<1x64xf32, #tpu.memory_space<vmem>>, vector<1x64xf32>
    %17 = vector.broadcast %16 : vector<1x64xf32> to vector<16x64xf32>
    %18 = arith.mulf %15, %17 : vector<16x64xf32>
    %c0_13 = arith.constant 0 : index
    %c0_14 = arith.constant 0 : index
    %19 = vector.load %arg4[%c0_13, %c0_14] : memref<1x64xf32, #tpu.memory_space<vmem>>, vector<1x64xf32>
    %20 = vector.broadcast %19 : vector<1x64xf32> to vector<16x64xf32>
    %21 = arith.addf %18, %20 : vector<16x64xf32>
    %cst_15 = arith.constant 5.000000e-01 : f32
    %22 = vector.broadcast %cst_15 : f32 to vector<16x64xf32>
    %23 = arith.mulf %22, %21 : vector<16x64xf32>
    %cst_16 = arith.constant 4.471500e-02 : f32
    %24 = vector.broadcast %cst_16 : f32 to vector<16x64xf32>
    %25 = arith.mulf %24, %21 : vector<16x64xf32>
    %26 = arith.mulf %25, %21 : vector<16x64xf32>
    %27 = arith.mulf %26, %21 : vector<16x64xf32>
    %28 = arith.addf %21, %27 : vector<16x64xf32>
    %cst_17 = arith.constant 0.797884583 : f32
    %29 = vector.broadcast %cst_17 : f32 to vector<16x64xf32>
    %30 = arith.mulf %29, %28 : vector<16x64xf32>
    %31 = math.tanh %30 : vector<16x64xf32>
    %cst_18 = arith.constant 1.000000e+00 : f32
    %32 = vector.broadcast %cst_18 : f32 to vector<16x64xf32>
    %33 = arith.addf %32, %31 : vector<16x64xf32>
    %34 = arith.mulf %23, %33 : vector<16x64xf32>
    %35 = arith.truncf %34 : vector<16x64xf32> to vector<16x64xbf16>
    %cst_19 = arith.constant 0.000000e+00 : bf16
    %36 = vector.broadcast %cst_19 : bf16 to vector<1x64xbf16>
    %37 = tpu.concatenate %36, %35, %36 in 0 : vector<1x64xbf16>, vector<16x64xbf16>, vector<1x64xbf16> -> vector<18x64xbf16>
    %38 = vector.extract_strided_slice %37 {offsets = [0, 0], sizes = [16, 64], strides = [1, 1]} : vector<18x64xbf16> to vector<16x64xbf16>
    %c0_20 = arith.constant 0 : index
    %c0_21 = arith.constant 0 : index
    %c0_22 = arith.constant 0 : index
    %39 = vector.load %arg5[%c0_20, %c0_21, %c0_22] : memref<3x64x128xbf16, #tpu.memory_space<vmem>>, vector<1x64x128xbf16>
    %40 = vector.shape_cast %39 : vector<1x64x128xbf16> to vector<64x128xbf16>
    %cst_23 = arith.constant dense<0.000000e+00> : vector<16x128xf32>
    %41 = tpu.matmul %38, %40, %cst_23 {dimension_numbers = #tpu.dot_dimension_numbers<[1], [0], [0], [1], [0, 0, 1, 1], [], []>} : vector<16x64xbf16>, vector<64x128xbf16>, vector<16x128xf32> -> vector<16x128xf32>
    %42 = vector.extract_strided_slice %37 {offsets = [1, 0], sizes = [16, 64], strides = [1, 1]} : vector<18x64xbf16> to vector<16x64xbf16>
    %c1_24 = arith.constant 1 : index
    %c0_25 = arith.constant 0 : index
    %c0_26 = arith.constant 0 : index
    %43 = vector.load %arg5[%c1_24, %c0_25, %c0_26] : memref<3x64x128xbf16, #tpu.memory_space<vmem>>, vector<1x64x128xbf16>
    %44 = vector.shape_cast %43 : vector<1x64x128xbf16> to vector<64x128xbf16>
    %cst_27 = arith.constant dense<0.000000e+00> : vector<16x128xf32>
    %45 = tpu.matmul %42, %44, %cst_27 {dimension_numbers = #tpu.dot_dimension_numbers<[1], [0], [0], [1], [0, 0, 1, 1], [], []>} : vector<16x64xbf16>, vector<64x128xbf16>, vector<16x128xf32> -> vector<16x128xf32>
    %46 = arith.addf %41, %45 : vector<16x128xf32>
    %47 = vector.extract_strided_slice %37 {offsets = [2, 0], sizes = [16, 64], strides = [1, 1]} : vector<18x64xbf16> to vector<16x64xbf16>
    %c2_28 = arith.constant 2 : index
    %c0_29 = arith.constant 0 : index
    %c0_30 = arith.constant 0 : index
    %48 = vector.load %arg5[%c2_28, %c0_29, %c0_30] : memref<3x64x128xbf16, #tpu.memory_space<vmem>>, vector<1x64x128xbf16>
    %49 = vector.shape_cast %48 : vector<1x64x128xbf16> to vector<64x128xbf16>
    %cst_31 = arith.constant dense<0.000000e+00> : vector<16x128xf32>
    %50 = tpu.matmul %47, %49, %cst_31 {dimension_numbers = #tpu.dot_dimension_numbers<[1], [0], [0], [1], [0, 0, 1, 1], [], []>} : vector<16x64xbf16>, vector<64x128xbf16>, vector<16x128xf32> -> vector<16x128xf32>
    %51 = arith.addf %46, %50 : vector<16x128xf32>
    %c0_32 = arith.constant 0 : index
    %c0_33 = arith.constant 0 : index
    %52 = vector.load %arg6[%c0_32, %c0_33] : memref<1x128xf32, #tpu.memory_space<vmem>>, vector<1x128xf32>
    %53 = vector.broadcast %52 : vector<1x128xf32> to vector<16x128xf32>
    %54 = arith.mulf %51, %53 : vector<16x128xf32>
    %c0_34 = arith.constant 0 : index
    %c0_35 = arith.constant 0 : index
    %55 = vector.load %arg7[%c0_34, %c0_35] : memref<1x128xf32, #tpu.memory_space<vmem>>, vector<1x128xf32>
    %56 = vector.broadcast %55 : vector<1x128xf32> to vector<16x128xf32>
    %57 = arith.addf %54, %56 : vector<16x128xf32>
    %cst_36 = arith.constant 5.000000e-01 : f32
    %58 = vector.broadcast %cst_36 : f32 to vector<16x128xf32>
    %59 = arith.mulf %58, %57 : vector<16x128xf32>
    %cst_37 = arith.constant 4.471500e-02 : f32
    %60 = vector.broadcast %cst_37 : f32 to vector<16x128xf32>
    %61 = arith.mulf %60, %57 : vector<16x128xf32>
    %62 = arith.mulf %61, %57 : vector<16x128xf32>
    %63 = arith.mulf %62, %57 : vector<16x128xf32>
    %64 = arith.addf %57, %63 : vector<16x128xf32>
    %cst_38 = arith.constant 0.797884583 : f32
    %65 = vector.broadcast %cst_38 : f32 to vector<16x128xf32>
    %66 = arith.mulf %65, %64 : vector<16x128xf32>
    %67 = math.tanh %66 : vector<16x128xf32>
    %cst_39 = arith.constant 1.000000e+00 : f32
    %68 = vector.broadcast %cst_39 : f32 to vector<16x128xf32>
    %69 = arith.addf %68, %67 : vector<16x128xf32>
    %70 = arith.mulf %59, %69 : vector<16x128xf32>
    %c0_40 = arith.constant 0 : index
    %c0_41 = arith.constant 0 : index
    %c0_42 = arith.constant 0 : index
    %71 = vector.load %arg8[%c0_40, %c0_41, %c0_42] : memref<1x16x128xf32, #tpu.memory_space<vmem>>, vector<1x16x128xf32>
    %72 = vector.shape_cast %71 : vector<1x16x128xf32> to vector<16x128xf32>
    %73 = vector.shape_cast %70 : vector<16x128xf32> to vector<1x16x128xf32>
    tpu.vector_store %arg8[%c0_40, %c0_41, %c0_42], %73 {strides = array<i32>} : memref<1x16x128xf32, #tpu.memory_space<vmem>>, vector<1x16x128xf32>,
    return
  }
  func.func @transform_0(%arg0: i32) -> (i32, i32, i32) {
    %c0_i32 = arith.constant 0 : i32
    %c0_i32_0 = arith.constant 0 : i32
    %c0_i32_1 = arith.constant 0 : i32
    return %arg0, %c0_i32, %c0_i32_0 : i32, i32, i32
  }
  func.func @transform_1(%arg0: i32) -> (i32, i32, i32) {
    %c0_i32 = arith.constant 0 : i32
    %c0_i32_0 = arith.constant 0 : i32
    %c0_i32_1 = arith.constant 0 : i32
    %c0_i32_2 = arith.constant 0 : i32
    return %c0_i32, %c0_i32_0, %c0_i32_1 : i32, i32, i32
  }
  func.func @transform_2(%arg0: i32) -> (i32, i32) {
    %c0_i32 = arith.constant 0 : i32
    %c0_i32_0 = arith.constant 0 : i32
    %c0_i32_1 = arith.constant 0 : i32
    return %c0_i32, %c0_i32_0 : i32, i32
  }
  func.func @transform_3(%arg0: i32) -> (i32, i32) {
    %c0_i32 = arith.constant 0 : i32
    %c0_i32_0 = arith.constant 0 : i32
    %c0_i32_1 = arith.constant 0 : i32
    return %c0_i32, %c0_i32_0 : i32, i32
  }
  func.func @transform_4(%arg0: i32) -> (i32, i32, i32) {
    %c0_i32 = arith.constant 0 : i32
    %c0_i32_0 = arith.constant 0 : i32
    %c0_i32_1 = arith.constant 0 : i32
    %c0_i32_2 = arith.constant 0 : i32
    return %c0_i32, %c0_i32_0, %c0_i32_1 : i32, i32, i32
  }
  func.func @transform_5(%arg0: i32) -> (i32, i32) {
    %c0_i32 = arith.constant 0 : i32
    %c0_i32_0 = arith.constant 0 : i32
    %c0_i32_1 = arith.constant 0 : i32
    return %c0_i32, %c0_i32_0 : i32, i32
  }
  func.func @transform_6(%arg0: i32) -> (i32, i32) {
    %c0_i32 = arith.constant 0 : i32
    %c0_i32_0 = arith.constant 0 : i32
    %c0_i32_1 = arith.constant 0 : i32
    return %c0_i32, %c0_i32_0 : i32, i32
  }
  func.func @transform_7(%arg0: i32) -> (i32, i32, i32) {
    %c0_i32 = arith.constant 0 : i32
    %c0_i32_0 = arith.constant 0 : i32
    %c0_i32_1 = arith.constant 0 : i32
    return %arg0, %c0_i32, %c0_i32_0 : i32, i32, i32
  }
}

</mosaic_0001>

<bundles_post_ra>
// kernel: unet_up_forward.1
= control target key start
LH: loop header
LB: loop body
LE: loop exit
PB: predicated region body
PF: predicated region fallthrough
CT: control target
= control target key end

     0   :  { %s1386_s24 = smov 0   ;;  %s1588_s0 = inlined_call_operand.vmem [shape: bf16[2,18,128], index: 0, kind: input, shape index: {}]   ;;  %s1589_s1 = inlined_call_operand.vmem [shape: bf16[3,128,64], index: 1, kind: input, shape index: {}]   ;;  %s1590_s2 = inlined_call_operand.vmem [shape: f32[1,64], index: 2, kind: input, shape index: {}]   ;;  %s1591_s3 = inlined_call_operand.vmem [shape: f32[1,64], index: 3, kind: input, shape index: {}]   ;;  %s1592_s4 = inlined_call_operand.vmem [shape: bf16[3,64,128], index: 4, kind: input, shape index: {}]   ;;  %s1593_s5 = inlined_call_operand.vmem [shape: f32[1,128], index: 5, kind: input, shape index: {}]   ;;  %s1594_s6 = inlined_call_operand.vmem [shape: f32[1,128], index: 6, kind: input, shape index: {}]   ;;  %s1595_s7 = inlined_call_operand.vmem [shape: f32[2,16,128], index: 7, kind: output, shape index: {}]  }
   0x1 LB: > { %s1023_s25 = sadd.s32 4294967295, %s1342_s24   ;;  %p1027_p0 = scmp.ge.s32.totalorder %s1342_s24, 1  ;;  %s1342_s24 = sphi %s1386_s24, %s17_s24  }
   0x2   : > { %p237_p1 = scmp.lt.s32.totalorder %s1342_s24, 3 }
   0x4   : > { %p238_p2 = pnand %p1027_p0, %p237_p1 }
   0x5   : > { %v1290_v0 = vld [vmem:[%s1589_s1] sm:$0xff] (!%p238_p2)   ;;  %v1344_v1 = vmov (!%p238_p2), 0.0   ;;  %v1291_v2 = vld [vmem:[%s1589_s1 + $0x8] sm:$0xff] (!%p238_p2)   ;;  %vm1345_vm0 = vmmov (!%p238_p2), 0   ;;  %p269_p3 = scmp.lt.s32.totalorder (!%p238_p2), %s1023_s25, 1  ;;  %v1292_v3 = vld [vmem:[%s1589_s1 + $0x10] sm:$0xff] (!%p238_p2)  }
   0x6   : > { %241 = sbr.rel (%p238_p2) target bundleno = 607 (0x25f), region = 48  ;;  %1189 = vmatprep.subr.bf16.mxu0 (!%p238_p2), %v1344_v1  ;;  %1169 = vmatprep.subr.bf16.mxu1 (!%p238_p2), %v1344_v1  ;;  %v1298_v4 = vld [vmem:[%s1589_s1 + $0x40] sm:$0xff] (!%p238_p2)   ;;  %v1293_v5 = vld [vmem:[%s1589_s1 + $0x18] sm:$0xff] (!%p238_p2)   ;;  %v1301_v6 = vld [vmem:[%s1589_s1 + $0x48] sm:$0xff] (!%p238_p2)   ;;  %vm324_vm1 = vsmask.f32 (!%p238_p2), 7424 }
   0x7   : > { %1190 = vmatpush3.bf16.msra.mxu0 (!%p238_p2), %v1290_v0  ;;  %1205 = vmatprep.mubr.msk.bf16.mxu0 (!%p238_p2), %vm1345_vm0, %v1344_v1  ;;  %v1294_v7 = vld [vmem:[%s1589_s1 + $0x20] sm:$0xff] (!%p238_p2)   ;;  %v1303_v8 = vld [vmem:[%s1589_s1 + $0x50] sm:$0xff] (!%p238_p2)   ;;  %v1295_v9 = vld [vmem:[%s1589_s1 + $0x28] sm:$0xff] (!%p238_p2)   ;;  %vm534_vm2 = vcmask (!%p238_p2), 1046528   ;;  %vm676_vm3 = vcmask (!%p238_p2), 1040384   ;;  %vm734_vm6 = vcmask (!%p238_p2), 523264  }
   0x8   : > { %1191 = vmatprep.subr.bf16.mxu0 (!%p238_p2), %v1344_v1  ;;  %1185 = vmatprep.mubr.msk.bf16.mxu1 (!%p238_p2), %vm1345_vm0, %v1344_v1  ;;  %v1305_v10 = vld [vmem:[%s1589_s1 + $0x58] sm:$0xff] (!%p238_p2)   ;;  %v1296_v12 = vld [vmem:[%s1589_s1 + $0x30] sm:$0xff] (!%p238_p2)   ;;  %v1307_v13 = vld [vmem:[%s1589_s1 + $0x60] sm:$0xff] (!%p238_p2)   ;;  %vm677_vm4 = vsmask.f32 (!%p238_p2), 256 }
   0x9   : > { %1170 = vmatpush3.bf16.msra.mxu1 (!%p238_p2), %v1298_v4  ;;  %v1297_v16 = vld [vmem:[%s1589_s1 + $0x38] sm:$0xff] (!%p238_p2)   ;;  %v1309_v18 = vld [vmem:[%s1589_s1 + $0x68] sm:$0xff] (!%p238_p2)   ;;  %v1300_v20 = vld [vmem:[%s1589_s1 + $0x80] sm:$0xff] (!%p238_p2)  }
   0xa   : > { %1171 = vmatprep.subr.bf16.mxu1 (!%p238_p2), %v1344_v1  ;;  %v1311_v21 = vld [vmem:[%s1589_s1 + $0x70] sm:$0xff] (!%p238_p2)   ;;  %v1302_v23 = vld [vmem:[%s1589_s1 + $0x88] sm:$0xff] (!%p238_p2)   ;;  %v1313_v24 = vld [vmem:[%s1589_s1 + $0x78] sm:$0xff] (!%p238_p2)  }
   0xb   : > { %1192 = vmatpush3.bf16.msra.mxu0 (!%p238_p2), %v1291_v2  ;;  %v1304_v27 = vld [vmem:[%s1589_s1 + $0x90] sm:$0xff] (!%p238_p2)   ;;  %v1306_v29 = vld [vmem:[%s1589_s1 + $0x98] sm:$0xff] (!%p238_p2)   ;;  %v1308_v30 = vld [vmem:[%s1589_s1 + $0xa0] sm:$0xff] (!%p238_p2)  }
   0xc   : > { %1193 = vmatprep.subr.bf16.mxu0 (!%p238_p2), %v1344_v1  ;;  %v1310_v31 = vld [vmem:[%s1589_s1 + $0xa8] sm:$0xff] (!%p238_p2)   ;;  %v1312_v32 = vld [vmem:[%s1589_s1 + $0xb0] sm:$0xff] (!%p238_p2)   ;;  %v1315_v33 = vld [vmem:[%s1589_s1 + $0xb8] sm:$0xff] (!%p238_p2)  }
   0xd   : > { %s1597_s25 = smov (!%p269_p3, %s1023_s25), 1  ;;  %1172 = vmatpush3.bf16.msra.mxu1 %v1301_v6  ;;  %v1316_v37 = vld [vmem:[%s1592_s4 + $0x20] sm:$0xff]   ;;  %v1317_v38 = vld [vmem:[%s1592_s4 + $0x28] sm:$0xff]   ;;  %v1318_v39 = vld [vmem:[%s1592_s4 + $0x30] sm:$0xff]  }
   0xe   : > { %s1279_s9 = smul.u32 12, %s1597_s25  ;;  %1173 = vmatprep.subr.bf16.mxu1 %v1344_v1  ;;  %v1319_v40 = vld [vmem:[%s1592_s4 + $0x38] sm:$0xff]   ;;  %v1089_v46 = vld [vmem:[%s1590_s2] ss:$0 sm:$0xff]  ;;  %vm678_vm5 = vmand %vm676_vm3, %vm677_vm4  ;;  %s1126_s26 = sshll.u32 %s1597_s25, 4 }
   0xf   : > { %1194 = vmatpush3.bf16.msra.mxu0 %v1292_v3  ;;  %v1090_v49 = vld [vmem:[%s1591_s3] ss:$0 sm:$0xff]  ;;  %s278_s29 = scalar_lea.vmem %s1595_s7, %s1126_s26 }
  0x10   : > { %s273_s14 = scalar_lea.vmem %s1588_s0, %s1279_s9  ;;  %1195 = vmatprep.subr.bf16.mxu0 %v1344_v1 }
  0x11   : > { %1174 = vmatpush3.bf16.msra.mxu1 %v1303_v8  ;;  %v1444_v11 = vld [vmem:[%s273_s14] sm:$0xff]   ;;  %v1314_v15 = vld [vmem:[%s273_s14 + $0x8] ss:$0 sps:$4 sm:$0x11]  }
  0x12   : > { %1175 = vmatprep.subr.bf16.mxu1 %v1344_v1  ;;  %v328_v14 = vshll.u32 %v1444_v11, 16  ;;  %v326_v17 = vshrl.u32 %v1444_v11, 16  ;;  %v333_v22 = vshll.u32 %v1314_v15, 16  ;;  %v535_v34 = vrot.slane %v1444_v11, 1 }
  0x13   : > { %1196 = vmatpush3.bf16.msra.mxu0 %v1293_v5  ;;  %v536_v35 = vrot.slane %v1314_v15, 1 }
  0x14   : > { %1197 = vmatprep.subr.bf16.mxu0 %v1344_v1  ;;  %v330_v19 = vrot.slane %v328_v14, 1  ;;  %v335_v26 = vrot.slane %v333_v22, 1 }
  0x15   : > { %1176 = vmatpush3.bf16.msra.mxu1 %v1305_v10  ;;  %v537_v36 = vsel %vm534_vm2, %v535_v34, %v536_v35 }
  0x16   : > { %1177 = vmatprep.subr.bf16.mxu1 %v1344_v1  ;;  %v331_v25 = vor.u32 %v330_v19, %v326_v17 }
  0x17   : > { %1198 = vmatpush3.bf16.msra.mxu0 %v1294_v7 }
  0x18   : > { %1199 = vmatprep.subr.bf16.mxu0 %v1344_v1  ;;  %v336_v28 = vsel %vm324_vm1, %v331_v25, %v335_v26  ;;  %v1320_v25 = vld [vmem:[%s1592_s4] sm:$0xff]  }
  0x19   : > { %1178 = vmatpush3.bf16.msra.mxu1 %v1307_v13 }
  0x1a   : > { %1179 = vmatprep.subr.bf16.mxu1 %v1344_v1 }
  0x1b   : > { %1200 = vmatpush3.bf16.msra.mxu0 %v1295_v9 }
  0x1c   : > { %1201 = vmatprep.subr.bf16.mxu0 %v1344_v1 }
  0x1d   : > { %1180 = vmatpush3.bf16.msra.mxu1 %v1309_v18 }
  0x1e   : > { %1181 = vmatprep.subr.bf16.mxu1 %v1344_v1 }
  0x1f   : > { %1202 = vmatpush3.bf16.msra.mxu0 %v1296_v12 }
  0x20   : > { %1203 = vmatprep.subr.bf16.mxu0 %v1344_v1 }
  0x21   : > { %1182 = vmatpush3.bf16.msra.mxu1 %v1311_v21 }
  0x22   : > { %1183 = vmatprep.subr.bf16.mxu1 %v1344_v1 }
  0x23   : > { %1204 = vmatpush3.bf16.msra.mxu0 %v1297_v16 }
  0x24   : > { %1209 = vmatprep.subr.bf16.mxu0 %v1344_v1 }
  0x25   : > { %1184 = vmatpush3.bf16.msra.mxu1 %v1313_v24 }
  0x26   : > { %1206 = vmatmul.mubr.bf16.vlgmr.msra.gmra.mrb[0].mxu0 %v1444_v11  ;;  %1229 = vmatprep.subr.bf16.mxu1 %v1344_v1 }
  0x27   : > { %1210 = vmatpush3.bf16.msra.mxu0 %v1300_v20  ;;  %1225 = vmatprep.mubr.msk.bf16.mxu0 %vm1345_vm0, %v1344_v1 }
  0x28   : > { %1211 = vmatprep.subr.bf16.mxu0 %v1344_v1  ;;  %1186 = vmatmul.mubr.bf16.vlgmr.msra.gmra.mrb[0].mxu1 %v336_v28  ;;  %v1322_v28 = vld [vmem:[%s1592_s4 + $0x10] sm:$0xff]  }
  0x29   : > { %1237 = vmatprep.mubr.msk.bf16.mxu1 %vm1345_vm0, %v1344_v1  ;;  %1230 = vmatpush3.bf16.msra.mxu1 %v1316_v37  ;;  %v1122_v37 = vld [vmem:[%s1593_s5] ss:$0 sm:$0xff] }
  0x2a   : > { %1231 = vmatprep.subr.bf16.mxu1 %v1344_v1 }
  0x2b   : > { %1212 = vmatpush3.bf16.msra.mxu0 %v1302_v23 }
  0x2c   : > { %1213 = vmatprep.subr.bf16.mxu0 %v1344_v1 }
  0x2d   : > { %1232 = vmatpush3.bf16.msra.mxu1 %v1317_v38 }
  0x2e   : > { %1233 = vmatprep.subr.bf16.mxu1 %v1344_v1 }
  0x2f   : > { %1214 = vmatpush3.bf16.msra.mxu0 %v1304_v27  ;;  %v1321_v27 = vld [vmem:[%s1592_s4 + $0x8] sm:$0xff]  }
  0x30   : > { %1215 = vmatprep.subr.bf16.mxu0 %v1344_v1 }
  0x31   : > { %1234 = vmatpush3.bf16.msra.mxu1 %v1318_v39  ;;  %v1123_v39 = vld [vmem:[%s1594_s6] ss:$0 sm:$0xff] }
  0x32   : > { %1235 = vmatprep.subr.bf16.mxu1 %v1344_v1 }
  0x33   : > { %1216 = vmatpush3.bf16.msra.mxu0 %v1306_v29  ;;  %v1323_v29 = vld [vmem:[%s1592_s4 + $0x18] sm:$0xff]  }
  0x34   : > { %1217 = vmatprep.subr.bf16.mxu0 %v1344_v1 }
  0x35   : > { %1236 = vmatpush3.bf16.msra.mxu1 %v1319_v40 }
  0x36   : > { %1241 = vmatprep.subr.bf16.mxu1 %v1344_v1 }
  0x37   : > { %1218 = vmatpush3.bf16.msra.mxu0 %v1308_v30  ;;  %v1324_v30 = vld [vmem:[%s1592_s4 + $0x40] sm:$0xff]  }
  0x38   : > { %1219 = vmatprep.subr.bf16.mxu0 %v1344_v1 }
  0x3b   : > { %1220 = vmatpush3.bf16.msra.mxu0 %v1310_v31  ;;  %v1325_v31 = vld [vmem:[%s1592_s4 + $0x48] sm:$0xff]  }
  0x3c   : > { %1221 = vmatprep.subr.bf16.mxu0 %v1344_v1 }
  0x3f   : > { %1222 = vmatpush3.bf16.msra.mxu0 %v1312_v32  ;;  %v1326_v32 = vld [vmem:[%s1592_s4 + $0x50] sm:$0xff]  }
  0x40   : > { %1223 = vmatprep.subr.bf16.mxu0 %v1344_v1 }
  0x43   : > { %1224 = vmatpush3.bf16.msra.mxu0 %v1315_v33  ;;  %v1327_v33 = vld [vmem:[%s1592_s4 + $0x58] sm:$0xff]  }
  0x46   : > { %1226 = vmatmul.mubr.bf16.vlgmr.msra.gmra.mrb[0].mxu0 %v537_v36 }
  0xfb   : > { %v420_v41 = vpop.f32.mrb[0].mxu1 }
  0xfc   : > { %v1187_v42 = vpop.f32.mrb[1].mxu1 }
  0xfd   : > { %v423_v43 = vpop.f32.mrb[2].mxu1 }
  0xfe   : > { %v1188_v44 = vpop.f32.mrb[3].mxu1 }
 0x119   : > { %v621_v45 = vpop.f32.mrb[0].mxu0 }
 0x11a   : > { %v1265_v47 = vadd.f32 %v621_v45, %v420_v41  ;;  %v1227_v48 = vpop.f32.mrb[1].mxu0 }
 0x11b   : > { %v624_v50 = vpop.f32.mrb[2].mxu0 }
 0x11c   : > { %v637_v51 = vmul.f32 %v1265_v47, %v1089_v46  ;;  %v1266_v52 = vadd.f32 %v624_v50, %v423_v43  ;;  %v1228_v53 = vpop.f32.mrb[3].mxu0 }
 0x11e   : > { %v646_v54 = vadd.f32 %v1090_v49, %v637_v51  ;;  %v638_v55 = vmul.f32 %v1266_v52, %v1089_v46 }
 0x120   : > { %v650_v56 = vmul.f32 0.044715, %v646_v54  ;;  %v647_v57 = vadd.f32 %v1090_v49, %v638_v55  ;;  %v648_v7 = vmul.f32 0.5, %v646_v54 }
 0x122   : > { %v652_v58 = vmul.f32 %v650_v56, %v646_v54  ;;  %v651_v59 = vmul.f32 0.044715, %v647_v57  ;;  %v649_v8 = vmul.f32 0.5, %v647_v57 }
 0x124   : > { %v654_v60 = vmul.f32 %v652_v58, %v646_v54  ;;  %v653_v61 = vmul.f32 %v651_v59, %v647_v57 }
 0x126   : > { %v656_v62 = vadd.f32 %v654_v60, %v646_v54  ;;  %v655_v63 = vmul.f32 %v653_v61, %v647_v57 }
 0x128   : > { %v658_v0 = vmul.f32 0.7978846, %v656_v62  ;;  %v657_v2 = vadd.f32 %v655_v63, %v647_v57 }
 0x12a   : > { %1328 = vtanh.f32 %v658_v0  ;;  %v659_v3 = vmul.f32 0.7978846, %v657_v2 }
 0x12c   : > { %1330 = vtanh.f32 %v659_v3 }
 0x134   : > { %v1329_v4 = vpop.eup %1328 }
 0x135   : > { %v662_v5 = vadd.f32 1.0, %v1329_v4 }
 0x136   : > { %v1331_v6 = vpop.eup %1330 }
 0x137   : > { %v663_v9 = vadd.f32 1.0, %v1331_v6  ;;  %v664_v10 = vmul.f32 %v662_v5, %v648_v7 }
 0x139   : > { %v665_v11 = vmul.f32 %v663_v9, %v649_v8 }
 0x13b   : > { %v666_v12 = vpack.c.bf16 %v665_v11, %v664_v10 }
 0x13d   : > { %v668_v13 = vshrl.u32 %v666_v12, 16  ;;  %v671_v15 = vshll.u32 %v666_v12, 16 }
 0x13f   : > { %v670_v14 = vrot.slane %v668_v13, 7 }
 0x141   : > { %v673_v16 = vor.u32 %v671_v15, %v670_v14  ;;  %v680_v17 = vsel %vm678_vm5, %v670_v14, 0 }
 0x142   : > { %v706_v20 = vshll.u32 %v680_v17, 16  ;;  %v858_v35 = vrot.slane %v680_v17, 1 }
 0x143   : > { %v679_v18 = vsel %vm678_vm5, 0, %v673_v16 }
 0x144   : > { %v701_v19 = vshll.u32 %v679_v18, 16  ;;  %v699_v21 = vshrl.u32 %v679_v18, 16  ;;  %v708_v24 = vrot.slane %v706_v20, 1  ;;  %v857_v34 = vrot.slane %v679_v18, 1 }
 0x146   : > { %v703_v22 = vrot.slane %v701_v19, 1  ;;  %v859_v36 = vsel %vm534_vm2, %v857_v34, %v858_v35 }
 0x148   : > { %v704_v23 = vor.u32 %v703_v22, %v699_v21 }
 0x14a   : > { %v709_v26 = vsel %vm324_vm1, %v704_v23, %v708_v24 }
 0x14b   : > { %1238 = vmatmul.mubr.msk.bf16.vlgmr.msra.gmra.mrb[4].mxu1 %vm734_vm6, %v709_v26 }
 0x14c   : > { %1242 = vmatpush3.bf16.msra.mxu1 %v1320_v25  ;;  %1249 = vmatprep.mubr.msk.bf16.mxu1 %vm1345_vm0, %v1344_v1 }
 0x14d   : > { %1243 = vmatprep.subr.bf16.mxu1 %v1344_v1 }
 0x150   : > { %1244 = vmatpush3.bf16.msra.mxu1 %v1321_v27 }
 0x151   : > { %1245 = vmatprep.subr.bf16.mxu1 %v1344_v1 }
 0x154   : > { %1246 = vmatpush3.bf16.msra.mxu1 %v1322_v28 }
 0x155   : > { %1247 = vmatprep.subr.bf16.mxu1 %v1344_v1 }
 0x158   : > { %1248 = vmatpush3.bf16.msra.mxu1 %v1323_v29 }
 0x159   : > { %1253 = vmatprep.subr.bf16.mxu1 %v1344_v1 }
 0x15b   : > { %1250 = vmatmul.mubr.msk.bf16.vlgmr.msra.gmra.mrb[4].mxu1 %vm734_vm6, %v679_v18 }
 0x15c   : > { %1254 = vmatpush3.bf16.msra.mxu1 %v1324_v30  ;;  %1261 = vmatprep.mubr.msk.bf16.mxu1 %vm1345_vm0, %v1344_v1 }
 0x15d   : > { %1255 = vmatprep.subr.bf16.mxu1 %v1344_v1 }
 0x160   : > { %1256 = vmatpush3.bf16.msra.mxu1 %v1325_v31 }
 0x161   : > { %1257 = vmatprep.subr.bf16.mxu1 %v1344_v1 }
 0x164   : > { %1258 = vmatpush3.bf16.msra.mxu1 %v1326_v32 }
 0x165   : > { %1259 = vmatprep.subr.bf16.mxu1 %v1344_v1 }
 0x168   : > { %1260 = vmatpush3.bf16.msra.mxu1 %v1327_v33 }
 0x16b   : > { %1262 = vmatmul.mubr.msk.bf16.vlgmr.msra.gmra.mrb[4].mxu1 %vm734_vm6, %v859_v36 }
 0x23e   : > { %v921_v38 = vpop.f32.mrb[4].mxu1 }
 0x23f   : > { %v937_v40 = vmul.f32 %v1122_v37, %v921_v38  ;;  %v1263_v41 = vpop.f32.mrb[5].mxu1 }
 0x240   : > { %v924_v42 = vpop.f32.mrb[6].mxu1 }
 0x241   : > { %v946_v1 = vadd.f32 %v1123_v39, %v937_v40  ;;  %v938_v43 = vmul.f32 %v1122_v37, %v924_v42  ;;  %v1264_v44 = vpop.f32.mrb[7].mxu1 }
 0x243   : > { %v950_v45 = vmul.f32 0.044715, %v946_v1  ;;  %v947_v46 = vadd.f32 %v1123_v39, %v938_v43  ;;  %v948_v57 = vmul.f32 0.5, %v946_v1 }
 0x245   : > { %v952_v47 = vmul.f32 %v950_v45, %v946_v1  ;;  %v951_v48 = vmul.f32 0.044715, %v947_v46  ;;  %v949_v61 = vmul.f32 0.5, %v947_v46 }
 0x247   : > { %v954_v49 = vmul.f32 %v952_v47, %v946_v1  ;;  %v953_v50 = vmul.f32 %v951_v48, %v947_v46 }
 0x249   : > { %v956_v51 = vadd.f32 %v954_v49, %v946_v1  ;;  %v955_v52 = vmul.f32 %v953_v50, %v947_v46 }
 0x24b   : > { %v958_v53 = vmul.f32 0.7978846, %v956_v51  ;;  %v957_v54 = vadd.f32 %v955_v52, %v947_v46 }
 0x24d   : > { %1332 = vtanh.f32 %v958_v53  ;;  %v959_v55 = vmul.f32 0.7978846, %v957_v54 }
 0x24f   : > { %1334 = vtanh.f32 %v959_v55 }
 0x257   : > { %v1333_v56 = vpop.eup %1332 }
 0x258   : > { %v962_v58 = vadd.f32 1.0, %v1333_v56 }
 0x259   : > { %v1335_v59 = vpop.eup %1334 }
 0x25a   : > { %v964_v60 = vmul.f32 %v962_v58, %v948_v57  ;;  %v963_v62 = vadd.f32 1.0, %v1335_v59 }
 0x25c   : > { %966 = vst [vmem:[%s278_s29] sm:$0xff] %v964_v60  ;;  %v965_v63 = vmul.f32 %v963_v62, %v949_v61 }
 0x25e   : > { %967 = vst [vmem:[%s278_s29 + $0x8] sm:$0xff] %v965_v63 }
 0x25f PF: > { %s17_s24 = sadd.s32 1, %s1342_s24  }
 0x260   : > { %p14_p4 = scmp.ge.s32.totalorder %s17_s24, 4  }
 0x262   :  { %16 = sbr.rel (!%p14_p4) target bundleno = 1 (0x1), region = 82 }

</bundles_post_ra>
